<compile_context>
chip_gen: v7x
topology: tpu7x:2x2x1
jax: 0.10.0
libtpu: 0.0.40
codegen_flags: <defaults>
</compile_context>

<pallas_src>
import math

import jax
import jax.numpy as jnp
import numpy as np
from jax.experimental import pallas as pl
from jax.experimental.pallas import tpu as pltpu


# ---------------------------------------------------------------------------
# Pallas kernel: fused linear (x @ Wt + b) + log_softmax over the vocab axis
# ---------------------------------------------------------------------------

def _generator_kernel(x_ref, wt_ref, b_ref, o_ref):
    x = x_ref[...]           # (TM, D)
    wt = wt_ref[...]         # (D, V)  -- pre-transposed, lane-dense, canonical MXU RHS
    b = b_ref[...]           # (1, V)

    logits = jnp.dot(x, wt, preferred_element_type=jnp.float32) + b    # (TM, V) f32

    # Numerically stable log_softmax along the last axis (matches F.log_softmax).
    m = jnp.max(logits, axis=-1, keepdims=True)
    z = logits - m
    lse = jnp.log(jnp.sum(jnp.exp(z), axis=-1, keepdims=True))
    o_ref[...] = (z - lse).astype(o_ref.dtype)


def generator_pallas(x, w, b, *, row_tile=256, use_bf16=False):
    """x: (..., D), w: (V, D) nn.Linear layout, b: (V,) -> (..., V) log-probs."""
    *lead, D = x.shape
    V = w.shape[0]
    N = int(np.prod(lead)) if lead else 1

    # Single grid step unless there are enough rows per step to amortize the
    # ~0.35 us fixed per-step pipeline overhead. Multiples of 8 keep full
    # sublanes on f32 stores.
    if N <= row_tile or N % row_tile != 0:
        tm = N
    else:
        tm = row_tile
    grid = (N // tm,)

    x2 = x.reshape(N, D)
    wt = w.T                          # (D, V): one-time layout plumbing in the wrapper
    b2 = b.reshape(1, V)

    if use_bf16:
        # Halves weight DMA bytes / VMEM and doubles MXU throughput at scale.
        # (Loosen accuracy tolerance if enabled.)
        x2 = x2.astype(jnp.bfloat16)
        wt = wt.astype(jnp.bfloat16)

    out_dtype = x.dtype
    cost = pl.CostEstimate(
        flops=2 * N * D * V,
        transcendentals=N * V,
        bytes_accessed=(x2.size * x2.dtype.itemsize
                        + wt.size * wt.dtype.itemsize
                        + b2.size * b2.dtype.itemsize
                        + N * V * jnp.dtype(out_dtype).itemsize),
    )

    out = pl.pallas_call(
        _generator_kernel,
        out_shape=jax.ShapeDtypeStruct((N, V), out_dtype),
        grid=grid,
        in_specs=[
            pl.BlockSpec((tm, D), lambda i: (i, 0)),   # row tile of activations
            pl.BlockSpec((D, V), lambda i: (0, 0)),    # full (D, V) weight, resident
            pl.BlockSpec((1, V), lambda i: (0, 0)),    # bias row
        ],
        out_specs=pl.BlockSpec((tm, V), lambda i: (i, 0)),  # lane-dense (V >= 128)
        compiler_params=pltpu.CompilerParams(
            dimension_semantics=("parallel",)),
        cost_estimate=cost,
    )(x2, wt, b2)

    return out.reshape(*lead, V)


# Pure-JAX reference for verification.
def generator_ref(x, w, b):
    return jax.nn.log_softmax(x @ w.T + b, axis=-1)


# ---------------------------------------------------------------------------
# main
# ---------------------------------------------------------------------------

if __name__ == "__main__":
    B, S, D, V = 2, 8, 32, 128       # batch, seq, d_model, vocab

    key0 = jax.random.PRNGKey(0)
    k_w, k_b, k_x = jax.random.split(key0, 3)

    # Deterministic parameter init, matching nn.Linear(d_model, vocab) fan-in bound.
    bound = 1.0 / math.sqrt(D)
    W = jax.random.uniform(k_w, (V, D), jnp.float32, -bound, bound)
    b = jax.random.uniform(k_b, (V,), jnp.float32, -bound, bound)

    x = jax.random.normal(k_x, (B, S, D), jnp.float32)

    out = generator_pallas(x, W, b)
    out = jax.block_until_ready(out)

    ref = generator_ref(x, W, b)
    assert out.shape == (B, S, V)
    np.testing.assert_allclose(np.asarray(out), np.asarray(ref), atol=1e-4, rtol=1e-4)

    print("KERNEL_OK")
</pallas_src>

<mosaic_0001>
module attributes {stable_mosaic.version = 11 : i64} {
  func.func @_generator_kernel(%arg0: i32, %arg1: memref<16x32xf32, #tpu.memory_space<vmem>>, %arg2: memref<32x128xf32, #tpu.memory_space<vmem>>, %arg3: memref<1x128xf32, #tpu.memory_space<vmem>>, %arg4: memref<16x128xf32, #tpu.memory_space<vmem>>) attributes {dimension_semantics = [#tpu.dimension_semantics<parallel>], iteration_bounds = array<i64: 1>, scalar_prefetch = 0 : i64, scratch_operands = 0 : i64, tpu.core_type = #tpu.core_type<tc>, window_params = [{transform_indices = @transform_0, window_bounds = array<i64: 16, 32>}, {pipeline_mode = #tpu.pipeline_mode<synchronous>, transform_indices = @transform_1, window_bounds = array<i64: 32, 128>}, {pipeline_mode = #tpu.pipeline_mode<synchronous>, transform_indices = @transform_2, window_bounds = array<i64: 1, 128>}, {transform_indices = @transform_3, window_bounds = array<i64: 16, 128>}]} {
    %c0 = arith.constant 0 : index
    %c0_0 = arith.constant 0 : index
    %0 = vector.load %arg1[%c0, %c0_0] : memref<16x32xf32, #tpu.memory_space<vmem>>, vector<16x32xf32>
    %c0_1 = arith.constant 0 : index
    %c0_2 = arith.constant 0 : index
    %1 = vector.load %arg2[%c0_1, %c0_2] : memref<32x128xf32, #tpu.memory_space<vmem>>, vector<32x128xf32>
    %c0_3 = arith.constant 0 : index
    %c0_4 = arith.constant 0 : index
    %2 = vector.load %arg3[%c0_3, %c0_4] : memref<1x128xf32, #tpu.memory_space<vmem>>, vector<1x128xf32>
    %cst = arith.constant dense<0.000000e+00> : vector<16x128xf32>
    %3 = tpu.matmul %0, %1, %cst {dimension_numbers = #tpu.dot_dimension_numbers<[1], [0], [0], [1], [0, 0, 1, 1], [], []>} : vector<16x32xf32>, vector<32x128xf32>, vector<16x128xf32> -> vector<16x128xf32>
    %4 = vector.broadcast %2 : vector<1x128xf32> to vector<16x128xf32>
    %5 = arith.addf %3, %4 : vector<16x128xf32>
    %cst_5 = arith.constant dense<0xFF800000> : vector<16xf32>
    %6 = vector.multi_reduction <maximumf>, %5, %cst_5 [1] : vector<16x128xf32> to vector<16xf32>
    %7 = vector.shape_cast %6 : vector<16xf32> to vector<16x1xf32>
    %8 = vector.broadcast %7 : vector<16x1xf32> to vector<16x128xf32>
    %9 = arith.subf %5, %8 : vector<16x128xf32>
    %10 = math.exp %9 : vector<16x128xf32>
    %cst_6 = arith.constant dense<0.000000e+00> : vector<16xf32>
    %11 = vector.multi_reduction <add>, %10, %cst_6 [1] : vector<16x128xf32> to vector<16xf32>
    %12 = vector.shape_cast %11 : vector<16xf32> to vector<16x1xf32>
    %13 = math.log %12 : vector<16x1xf32>
    %14 = vector.broadcast %13 : vector<16x1xf32> to vector<16x128xf32>
    %15 = arith.subf %9, %14 : vector<16x128xf32>
    %c0_7 = arith.constant 0 : index
    %c0_8 = arith.constant 0 : index
    %16 = vector.load %arg4[%c0_7, %c0_8] : memref<16x128xf32, #tpu.memory_space<vmem>>, vector<16x128xf32>
    tpu.vector_store %arg4[%c0_7, %c0_8], %15 {strides = array<i32>} : memref<16x128xf32, #tpu.memory_space<vmem>>, vector<16x128xf32>,
    return
  }
  func.func @transform_0(%arg0: i32) -> (i32, i32) {
    %c0_i32 = arith.constant 0 : i32
    %c0_i32_0 = arith.constant 0 : i32
    return %arg0, %c0_i32 : i32, i32
  }
  func.func @transform_1(%arg0: i32) -> (i32, i32) {
    %c0_i32 = arith.constant 0 : i32
    %c0_i32_0 = arith.constant 0 : i32
    %c0_i32_1 = arith.constant 0 : i32
    return %c0_i32, %c0_i32_0 : i32, i32
  }
  func.func @transform_2(%arg0: i32) -> (i32, i32) {
    %c0_i32 = arith.constant 0 : i32
    %c0_i32_0 = arith.constant 0 : i32
    %c0_i32_1 = arith.constant 0 : i32
    return %c0_i32, %c0_i32_0 : i32, i32
  }
  func.func @transform_3(%arg0: i32) -> (i32, i32) {
    %c0_i32 = arith.constant 0 : i32
    %c0_i32_0 = arith.constant 0 : i32
    return %arg0, %c0_i32 : i32, i32
  }
}

</mosaic_0001>

<bundles_post_ra>
// kernel: tpu_custom_call.1
= control target key start
LH: loop header
LB: loop body
LE: loop exit
PB: predicated region body
PF: predicated region fallthrough
CT: control target
= control target key end

     0   :  { %8 = vsyncpa [#allocation3], 0  ;;  %s364_s0 = inlined_call_operand.hbm [shape: f32[16,32], index: 0, kind: input, shape index: {}]   ;;  %s365_s1 = inlined_call_operand.hbm [shape: f32[32,128], index: 1, kind: input, shape index: {}]   ;;  %s366_s2 = inlined_call_operand.vmem [shape: f32[1,128], index: 2, kind: input, shape index: {}]   ;;  %s367_s3 = inlined_call_operand.hbm [shape: f32[16,128], index: 3, kind: output, shape index: {}]  }
   0x1   :  { %9 = vsyncpa [#allocation6], 0 }
   0x2   :  { %10 = vsyncpa [#allocation4], 0  ;;  %s291_s12 = smov [#allocation2]   ;;  %s219_s16 = scalar_lea.hbm %s364_s0, 256 }
   0x3   :  { %s16_s13 = sshll.u32 %s291_s12, 4  ;;  %p220_p0 = scmp.ne.s32.totalorder %s364_s0, %s219_s16  ;;  %s17_s13 = int_to_ptr.vmem [resolvable:$true] %s16_s13 }
   0x4   :  { %p223_p1 = scmp.lt.u32.totalorder %s219_s16, %s364_s0 }
   0x6   :  { %p225_p2 = pnand %p223_p1, %p220_p0 }
   0x8   :  { %228 = shalt.err (!%p225_p2)
}
   0x9   :  { %s229_s21 = scalar_lea.vmem %s17_s13, 256  ;;  %p234_p4 = scmp.lt.s32.totalorder %s17_s13, %s17_s13 }
   0xa   :  { %p230_p3 = scmp.ne.s32.totalorder %s17_s13, %s229_s21  ;;  %p235_p5 = scmp.lt.s32.totalorder %s229_s21, %s229_s21 }
   0xc   :  { %p236_p6 = por %p235_p5, %p234_p4 }
   0xe   :  { %p237_p7 = pnand %p236_p6, %p230_p3 }
  0x10   :  { %240 = shalt.err (!%p237_p7)
}
  0x11   :  { %s292_s22 = smov 128   ;;  %s293_s23 = smov 8  }
  0x12   :  { %22 = dma.hbm_to_vmem [thread:$0]  %s364_s0, 256, %s17_s13, [#allocation3], %s292_s22, %s292_s22, %s293_s23  }
  0x13   :  { %s294_s26 = smov [#allocation5]   ;;  %s241_s30 = scalar_lea.hbm %s365_s1, 512 }
  0x14   :  { %s28_s27 = sshll.u32 %s294_s26, 4  ;;  %p242_p8 = scmp.ne.s32.totalorder %s365_s1, %s241_s30  ;;  %s29_s27 = int_to_ptr.vmem [resolvable:$true] %s28_s27 }
  0x15   :  { %p245_p9 = scmp.lt.u32.totalorder %s241_s30, %s365_s1 }
  0x17   :  { %p247_p10 = pnand %p245_p9, %p242_p8 }
  0x19   :  { %250 = shalt.err (!%p247_p10)
}
  0x1a   :  { %s251_s8 = scalar_lea.vmem %s29_s27, 512  ;;  %p256_p12 = scmp.lt.s32.totalorder %s29_s27, %s29_s27 }
  0x1b   :  { %p252_p11 = scmp.ne.s32.totalorder %s29_s27, %s251_s8  ;;  %p257_p13 = scmp.lt.s32.totalorder %s251_s8, %s251_s8 }
  0x1d   :  { %p258_p0 = por %p257_p13, %p256_p12 }
  0x1f   :  { %p259_p1 = pnand %p258_p0, %p252_p11 }
  0x21   :  { %262 = shalt.err (!%p259_p1)
}
  0x22   :  { %34 = dma.hbm_to_vmem [thread:$0]  %s365_s1, 512, %s29_s27, [#allocation6], %s292_s22, %s292_s22, %s293_s23  }
  0x23   :  { %285 = dma.done.wait [#allocation3], 256  }
  0x24   :  { %286 = vsyncadd [#allocation3], 4294967040 }
  0x25   :  { %287 = dma.done.wait [#allocation6], 512  }
  0x26   :  { %288 = vsyncadd [#allocation6], 4294966784  ;;  %vm56_vm0 = vcmask 261120   ;;  %v45_v0 = vld [vmem:[#allocation5] sm:$0xff]  ;;  %v46_v1 = vld [vmem:[#allocation5 + $0x8] sm:$0xff] }
  0x27   :  { %v47_v2 = vld [vmem:[#allocation5 + $0x10] sm:$0xff]  ;;  %v198_v3 = vpack.c.bf16 %v46_v1, %v45_v0  ;;  %v48_v4 = vld [vmem:[#allocation5 + $0x18] sm:$0xff] }
  0x28   :  { %v43_v5 = vld [vmem:[#allocation2] sm:$0xff]  ;;  %v202_v6 = vpack.c.bf16 %v48_v4, %v47_v2  ;;  %v44_v7 = vld [vmem:[#allocation2 + $0x8] sm:$0xff] }
  0x29   :  { %195 = vmatprep.mubr.msk.f32.mxu0 %vm56_vm0, %v43_v5  ;;  %199 = vmatprep.subr.bf16.mxu0 %v198_v3  ;;  %v178_v8 = vld [vmem:[%s366_s2] ss:$0 sm:$0xff]  ;;  %s295_s2 = smov [#allocation7]  }
  0x2a   :  { %201 = vmatpush3.bf16.msra.mxu0 %v198_v3  ;;  %s165_s11 = sshll.u32 %s295_s2, 4  ;;  %s166_s11 = int_to_ptr.vmem [resolvable:$true] %s165_s11 }
  0x2b   :  { %203 = vmatprep.subr.bf16.mxu0 %v202_v6  ;;  %s263_s12 = scalar_lea.vmem %s166_s11, 256  ;;  %p268_p3 = scmp.lt.s32.totalorder %s166_s11, %s166_s11 }
  0x2c   :  { %p264_p2 = scmp.ne.s32.totalorder %s166_s11, %s263_s12  ;;  %p269_p4 = scmp.lt.s32.totalorder %s263_s12, %s263_s12 }
  0x2e   :  { %205 = vmatpush3.bf16.msra.mxu0 %v202_v6  ;;  %p270_p5 = por %p269_p4, %p268_p3 }
  0x30   :  { %p271_p6 = pnand %p270_p5, %p264_p2 }
  0x31   :  { %196 = vmatmul.mubr.msk.f32.vlgmr.msra.gmra.mrb[0].mxu0 %vm56_vm0, %v44_v7 }
 0x104   :  { %v197_v9 = vpop.f32.mrb[0].mxu0 }
 0x105   :  { %v129_v10 = vpop.f32.mrb[1].mxu0  ;;  %v135_v12 = vadd.f32 %v197_v9, %v178_v8 }
 0x106   :  { %v130_v11 = vadd.f32 %v178_v8, %v129_v10 }
 0x108   :  { %138 = vmax.xlane.f32.xlu0 %v130_v11 }
 0x10c   :  { %140 = vmax.xlane.f32.xlu0 %v135_v12 }
 0x195   :  { %v139_v13 = vpop.xlane.xlu0 %138 }
 0x196   :  { %v142_v14 = vsub.f32 %v130_v11, %v139_v13 }
 0x198   :  { %v144_v15 = vmul.f32 1.442695, %v142_v14 }
 0x199   :  { %v141_v16 = vpop.xlane.xlu0 %140 }
 0x19a   :  { %v143_v17 = vsub.f32 %v135_v12, %v141_v16  ;;  %211 = vpow2.f32 %v144_v15 }
 0x19c   :  { %v146_v18 = vmul.f32 1.442695, %v143_v17 }
 0x19e   :  { %213 = vpow2.f32 %v146_v18 }
 0x1a4   :  { %v212_v19 = vpop.eup %211 }
 0x1a5   :  { %148 = vadd.xlane.f32.xlu1 %v212_v19 }
 0x1a8   :  { %v214_v20 = vpop.eup %213 }
 0x1a9   :  { %150 = vadd.xlane.f32.xlu1 %v214_v20 }
 0x232   :  { %v149_v21 = vpop.xlane.xlu1 %148 }
 0x233   :  { %215 = vlog2.f32 %v149_v21 }
 0x236   :  { %v151_v22 = vpop.xlane.xlu1 %150 }
 0x237   :  { %217 = vlog2.f32 %v151_v22 }
 0x23d   :  { %v216_v23 = vpop.eup %215 }
 0x23e   :  { %v153_v24 = vmul.f32 0.6931472, %v216_v23 }
 0x240   :  { %v156_v25 = vsub.f32 %v142_v14, %v153_v24 }
 0x241   :  { %v218_v26 = vpop.eup %217 }
 0x242   :  { %158 = vst [vmem:[#allocation7] sm:$0xff] %v156_v25  ;;  %v155_v27 = vmul.f32 0.6931472, %v218_v26 }
 0x244   :  { %v157_v28 = vsub.f32 %v143_v17, %v155_v27 }
 0x246   :  { %159 = vst [vmem:[#allocation7 + $0x8] sm:$0xff] %v157_v28 }
 0x247   :  { %274 = shalt.err (!%p271_p6)
}
 0x248   :  { %s275_s15 = scalar_lea.hbm %s367_s3, 256 }
 0x249   :  { %p276_p7 = scmp.ne.s32.totalorder %s367_s3, %s275_s15  ;;  %p279_p8 = scmp.lt.u32.totalorder %s275_s15, %s367_s3 }
 0x24b   :  { %p281_p9 = pnand %p279_p8, %p276_p7 }
 0x24d   :  { %284 = shalt.err (!%p281_p9)
}
 0x24e   :  { %171 = dma.vmem_to_hbm [thread:$0]  %s166_s11, 256, %s367_s3, [#allocation4], %s292_s22, %s292_s22, %s293_s23  }
 0x24f   :  { %289 = dma.done.wait [#allocation4], 256  }
 0x250   :  { %290 = vsyncadd [#allocation4], 4294967040 }
 0x251   :  { %175 = vsyncpa [#allocation3], 1 }
 0x252   :  { %176 = vsyncpa [#allocation6], 1 }
 0x253   :  { %177 = vsyncpa [#allocation4], 1 }

</bundles_post_ra>
